<compile_context>
chip_gen: v7x
topology: tpu7x:2x2x1
jax: 0.10.0
libtpu: 0.0.40
codegen_flags: <defaults>
</compile_context>

<pallas_src>
import math
import numpy as np
import jax
import jax.numpy as jnp
from jax import lax
from jax.experimental import pallas as pl
from jax.experimental.pallas import tpu as pltpu

# ---------------- config (small, consistent with the module) ----------------
B = 2            # batch
S = 8            # seq_len (== max_seq_len), even (needed for lane-dense packing)
D = 64           # dim
H = 4            # n_heads
HKV = 2          # n_kv_heads
HD = D // H      # head_dim = 16
N_REP = H // HKV
MULTIPLE_OF = 64
_hidden = int(2 * (4 * D) / 3)
HIDDEN = MULTIPLE_OF * ((_hidden + MULTIPLE_OF - 1) // MULTIPLE_OF)   # 192
HIDP = 128 * ((HIDDEN + 127) // 128)                                   # 256 (vreg aligned)
EPS = 1e-5

QKV = H * HD + 2 * HKV * HD      # 128 fused q|k|v columns
KOFF = H * HD                    # 64  (k column offset)
VOFF = H * HD + HKV * HD         # 96  (v column offset)


# ------------------------------- Pallas kernel -------------------------------
def xiaoxin_block_kernel(x_ref, cos_ref, sin_ref, anw_ref, fnw_ref,
                         wqkv_ref, wo_ref, w13_ref, w2_ref, o_ref):
    x = x_ref[...]                                                    # (S, D)

    # ---- attention RMSNorm ----
    inv = lax.rsqrt(jnp.mean(x * x, axis=-1, keepdims=True) + EPS)
    xn = anw_ref[...] * (x * inv)                                     # (S, D)

    # ---- fused QKV (+ RoPE companion) projection, full-width RoPE FMA ----
    y = jnp.dot(xn, wqkv_ref[...], preferred_element_type=jnp.float32)  # (S, 2*QKV)
    # q/k rotated in place, v passes through (cos=1 / sin=0 on its lanes);
    # 1/sqrt(HD) is folded into the q weight columns.
    rot = y[:, :QKV] * cos_ref[...] + y[:, QKV:] * sin_ref[...]         # (S, QKV)

    # ---- head-major views via ONE 2-D transpose + sublane slices ----
    rotT = rot.T                                                       # (QKV, S)
    qT = rotT[:KOFF].reshape(H, HD, S)                                 # (H, HD, S)
    kT = rotT[KOFF:VOFF].reshape(HKV, HD, S)                           # (HKV, HD, S)
    vT = rotT[VOFF:].reshape(HKV, HD, S)                               # (HKV, HD, S)
    # GQA repeat_interleave: head h uses kv group h // N_REP (broadcast, no loop).
    kTr = jnp.broadcast_to(kT[:, None], (HKV, N_REP, HD, S)).reshape(H, HD, S)
    vTr = jnp.broadcast_to(vT[:, None], (HKV, N_REP, HD, S)).reshape(H, HD, S)
    q = jnp.transpose(qT, (0, 2, 1))                                   # (H, S, HD)

    # ---- causal mask (large finite negative; exp underflows to exactly 0) ----
    row = lax.broadcasted_iota(jnp.int32, (S, S), 0)
    col = lax.broadcasted_iota(jnp.int32, (S, S), 1)
    neg = jnp.where(col > row, jnp.float32(-1e30), jnp.float32(0.0))

    # ---- batched attention over heads (canonical dot_general forms) ----
    s = jnp.einsum('hqd,hdk->hqk', q, kTr,
                   preferred_element_type=jnp.float32)                 # (H, S, S)
    s = s + neg[None]
    s = s - jnp.max(s, axis=-1, keepdims=True)
    p = jnp.exp(s)
    probs = p * pl.reciprocal(jnp.sum(p, axis=-1, keepdims=True))      # exact recip
    oT = jnp.einsum('hdk,hqk->hdq', vTr, probs,
                    preferred_element_type=jnp.float32)                # (H, HD, S)

    # ---- heads -> (S, H*HD) with one reshape + 2-D transpose, fused Wo ----
    O = oT.reshape(H * HD, S).T                                        # (S, H*HD)
    attn = jnp.dot(O, wo_ref[...], preferred_element_type=jnp.float32)  # (S, D)

    # ---- first residual + ffn RMSNorm ----
    h1 = x + attn
    inv2 = lax.rsqrt(jnp.mean(h1 * h1, axis=-1, keepdims=True) + EPS)
    hn = fnw_ref[...] * (h1 * inv2)

    # ---- fused SwiGLU FFN: [w1|w3] in one matmul, 256-lane aligned halves ----
    y13 = jnp.dot(hn, w13_ref[...], preferred_element_type=jnp.float32)  # (S, 2*HIDP)
    a = y13[:, :HIDP]
    c = y13[:, HIDP:]
    ff = jnp.dot(a * jax.nn.sigmoid(a) * c, w2_ref[...],
                 preferred_element_type=jnp.float32)                     # (S, D)

    # ---- second residual, lane-dense packing: row i = [token i | token i+S/2] ----
    res = h1 + ff                                                        # (S, D)
    o_ref[...] = jnp.concatenate([res[:S // 2], res[S // 2:]],
                                 axis=-1).astype(o_ref.dtype)            # (S//2, 2*D)


def xiaoxin_block(x, params):
    """x: (B, S, D) -> (B, S, D). params: kernel-layout weights (see __main__)."""
    def const(shp):
        return pl.BlockSpec(shp, lambda i: (0,) * len(shp))   # resident across steps

    packed = pl.pallas_call(
        xiaoxin_block_kernel,
        out_shape=jax.ShapeDtypeStruct((B, S // 2, 2 * D), jnp.float32),
        grid=(B,),
        in_specs=[
            pl.BlockSpec((None, S, D), lambda i: (i, 0, 0)),   # x: one sequence/step
            const((S, QKV)),          # COS
            const((S, QKV)),          # SIN
            const((1, D)),            # attn norm weight
            const((1, D)),            # ffn norm weight
            const((D, 2 * QKV)),      # fused Wqkv (+ rotation companion)
            const((H * HD, D)),       # Wo
            const((D, 2 * HIDP)),     # fused [w1|w3], halves zero-padded to HIDP
            const((HIDP, D)),         # w2 (rows zero-padded to HIDP)
        ],
        out_specs=pl.BlockSpec((None, S // 2, 2 * D), lambda i: (i, 0, 0)),
        compiler_params=pltpu.CompilerParams(dimension_semantics=("parallel",)),
    )(x, params["COS"], params["SIN"], params["anw"], params["fnw"],
      params["Wqkv"], params["Wo"], params["w13"], params["w2p"])
    # Unpack the lane-dense slab: row i = [token i | token i + S//2].
    return jnp.concatenate([packed[..., :D], packed[..., D:]], axis=1)


# --------------------------- pure-JAX reference ------------------------------
def reference_block(x, cos, sin, p):
    hp = lax.Precision.HIGHEST

    def rms(v, w):
        return w * (v * lax.rsqrt(jnp.mean(v * v, axis=-1, keepdims=True) + EPS))

    xn = rms(x, p["attn_norm_w"])
    q = jnp.dot(xn, p["Wq"], precision=hp).reshape(B, S, H, HD)
    k = jnp.dot(xn, p["Wk"], precision=hp).reshape(B, S, HKV, HD)
    v = jnp.dot(xn, p["Wv"], precision=hp).reshape(B, S, HKV, HD)

    def rope(t):  # interleaved (view_as_complex) RoPE, exactly like the torch code
        te = t[..., 0::2]
        to = t[..., 1::2]
        c = cos[None, :, None, :]
        s = sin[None, :, None, :]
        re = te * c - to * s
        im = te * s + to * c
        return jnp.stack([re, im], axis=-1).reshape(t.shape)

    q = rope(q)
    k = rope(k)
    k = jnp.repeat(k, N_REP, axis=2)   # repeat_interleave over kv heads
    v = jnp.repeat(v, N_REP, axis=2)
    q, k, v = (t.transpose(0, 2, 1, 3) for t in (q, k, v))   # (B, H, S, HD)

    scores = jnp.einsum("bhqd,bhkd->bhqk", q, k, precision=hp) / math.sqrt(HD)
    mask = jnp.where(jnp.arange(S)[None, :] > jnp.arange(S)[:, None],
                     jnp.float32(-jnp.inf), jnp.float32(0.0))
    scores = scores + mask[None, None]
    probs = jax.nn.softmax(scores, axis=-1)
    o = jnp.einsum("bhqk,bhkd->bhqd", probs, v, precision=hp)
    o = o.transpose(0, 2, 1, 3).reshape(B, S, H * HD)
    attn = jnp.dot(o, p["Wo"], precision=hp)

    h = x + attn
    hn = rms(h, p["ffn_norm_w"])
    a = jnp.dot(hn, p["w1"], precision=hp)
    b3 = jnp.dot(hn, p["w3"], precision=hp)
    ff = jnp.dot(jax.nn.silu(a) * b3, p["w2"], precision=hp)
    return h + ff


# --------------------------------- main ---------------------------------------
if __name__ == "__main__":
    key = jax.random.PRNGKey(0)
    ks = jax.random.split(key, 10)

    # deterministic "module parameters" (already in x @ W layout, i.e. torch W.T)
    Wq = jax.random.normal(ks[0], (D, H * HD), jnp.float32) / math.sqrt(D)
    Wk = jax.random.normal(ks[1], (D, HKV * HD), jnp.float32) / math.sqrt(D)
    Wv = jax.random.normal(ks[2], (D, HKV * HD), jnp.float32) / math.sqrt(D)
    Wo = jax.random.normal(ks[3], (H * HD, D), jnp.float32) / math.sqrt(H * HD)
    W1 = jax.random.normal(ks[4], (D, HIDDEN), jnp.float32) / math.sqrt(D)
    W2 = jax.random.normal(ks[5], (HIDDEN, D), jnp.float32) / math.sqrt(HIDDEN)
    W3 = jax.random.normal(ks[6], (D, HIDDEN), jnp.float32) / math.sqrt(D)
    attn_norm_w = 1.0 + 0.1 * jax.random.normal(ks[7], (D,), jnp.float32)
    ffn_norm_w = 1.0 + 0.1 * jax.random.normal(ks[8], (D,), jnp.float32)

    # inputs
    x = jax.random.normal(ks[9], (B, S, D), jnp.float32)
    # pos_cis (rotary): cos/sin of shape (S, HD//2)
    freqs = 1.0 / (10000.0 ** (np.arange(0, HD, 2, dtype=np.float32) / HD))
    ang = np.outer(np.arange(S, dtype=np.float32), freqs)
    cos_np = np.cos(ang).astype(np.float32)
    sin_np = np.sin(ang).astype(np.float32)

    # ---- host-side kernel weight prep ------------------------------------------
    # Per-head half-split permutation ([evens | odds]) and its swapped version.
    perm = np.concatenate([np.arange(0, HD, 2), np.arange(1, HD, 2)])
    perm_sw = np.concatenate([np.arange(1, HD, 2), np.arange(0, HD, 2)])
    scale = 1.0 / math.sqrt(HD)        # fold attention score scale into Wq

    Wq_np = np.asarray(Wq).reshape(D, H, HD)
    Wk_np = np.asarray(Wk).reshape(D, HKV, HD)
    Wv_np = np.asarray(Wv)

    W_A = np.concatenate([
        (Wq_np[:, :, perm] * scale).reshape(D, H * HD),       # q (half-split, scaled)
        Wk_np[:, :, perm].reshape(D, HKV * HD),               # k (half-split)
        Wv_np,                                                # v (original order)
    ], axis=1).astype(np.float32)                             # (D, 128)
    W_B = np.concatenate([
        (Wq_np[:, :, perm_sw] * scale).reshape(D, H * HD),    # q halves swapped
        Wk_np[:, :, perm_sw].reshape(D, HKV * HD),            # k halves swapped
        np.zeros((D, HKV * HD), np.float32),                  # v needs no rotation
    ], axis=1).astype(np.float32)                             # (D, 128)
    Wqkv = jnp.asarray(np.concatenate([W_A, W_B], axis=1))    # (D, 256)

    # (S, 128) cos/sin slabs: [cos|cos] / [-sin|+sin] per q/k head block,
    # 1 / 0 over the v columns so v passes through the RoPE FMA.
    cs_blk = np.concatenate([cos_np, cos_np], axis=1)         # (S, HD)
    sn_blk = np.concatenate([-sin_np, sin_np], axis=1)        # (S, HD)
    COS = np.concatenate([np.tile(cs_blk, (1, H + HKV)),
                          np.ones((S, HKV * HD), np.float32)], axis=1)   # (S, 128)
    SIN = np.concatenate([np.tile(sn_blk, (1, H + HKV)),
                          np.zeros((S, HKV * HD), np.float32)], axis=1)  # (S, 128)

    # fused, vreg-aligned [w1 | w3] (each half padded 192 -> 256); w2 rows padded.
    W1p = np.zeros((D, HIDP), np.float32); W1p[:, :HIDDEN] = np.asarray(W1)
    W3p = np.zeros((D, HIDP), np.float32); W3p[:, :HIDDEN] = np.asarray(W3)
    W13 = jnp.asarray(np.concatenate([W1p, W3p], axis=1))     # (D, 512)
    W2p_np = np.zeros((HIDP, D), np.float32); W2p_np[:HIDDEN] = np.asarray(W2)
    W2p = jnp.asarray(W2p_np)                                  # (256, 64)

    kernel_params = dict(
        COS=jnp.asarray(COS), SIN=jnp.asarray(SIN),
        anw=attn_norm_w.reshape(1, D), fnw=ffn_norm_w.reshape(1, D),
        Wqkv=Wqkv, Wo=Wo, w13=W13, w2p=W2p,
    )
    ref_params = dict(
        attn_norm_w=attn_norm_w, ffn_norm_w=ffn_norm_w,
        Wq=Wq, Wk=Wk, Wv=Wv, Wo=Wo, w1=W1, w2=W2, w3=W3,
    )

    out = jax.block_until_ready(xiaoxin_block(x, kernel_params))

    ref = jax.block_until_ready(
        reference_block(x, jnp.asarray(cos_np), jnp.asarray(sin_np), ref_params))
    # Exact softmax reciprocal -> tighter parity than before (was 5e-3).
    np.testing.assert_allclose(np.asarray(out), np.asarray(ref),
                               rtol=2e-3, atol=2e-3)
    # past_kv: use_cache=False -> None (matches module semantics)
    print("KERNEL_OK")
</pallas_src>

<mosaic_0001>
module attributes {stable_mosaic.version = 11 : i64} {
  func.func @xiaoxin_block_kernel(%arg0: i32, %arg1: memref<1x8x64xf32, #tpu.memory_space<vmem>>, %arg2: memref<8x128xf32, #tpu.memory_space<vmem>>, %arg3: memref<8x128xf32, #tpu.memory_space<vmem>>, %arg4: memref<1x64xf32, #tpu.memory_space<vmem>>, %arg5: memref<1x64xf32, #tpu.memory_space<vmem>>, %arg6: memref<64x256xf32, #tpu.memory_space<vmem>>, %arg7: memref<64x64xf32, #tpu.memory_space<vmem>>, %arg8: memref<64x512xf32, #tpu.memory_space<vmem>>, %arg9: memref<256x64xf32, #tpu.memory_space<vmem>>, %arg10: memref<1x4x128xf32, #tpu.memory_space<vmem>>) attributes {dimension_semantics = [#tpu.dimension_semantics<parallel>], iteration_bounds = array<i64: 2>, scalar_prefetch = 0 : i64, scratch_operands = 0 : i64, tpu.core_type = #tpu.core_type<tc>, window_params = [{transform_indices = @transform_0, window_bounds = array<i64: 1, 8, 64>}, {pipeline_mode = #tpu.pipeline_mode<synchronous>, transform_indices = @transform_1, window_bounds = array<i64: 8, 128>}, {pipeline_mode = #tpu.pipeline_mode<synchronous>, transform_indices = @transform_2, window_bounds = array<i64: 8, 128>}, {pipeline_mode = #tpu.pipeline_mode<synchronous>, transform_indices = @transform_3, window_bounds = array<i64: 1, 64>}, {pipeline_mode = #tpu.pipeline_mode<synchronous>, transform_indices = @transform_4, window_bounds = array<i64: 1, 64>}, {pipeline_mode = #tpu.pipeline_mode<synchronous>, transform_indices = @transform_5, window_bounds = array<i64: 64, 256>}, {pipeline_mode = #tpu.pipeline_mode<synchronous>, transform_indices = @transform_6, window_bounds = array<i64: 64, 64>}, {pipeline_mode = #tpu.pipeline_mode<synchronous>, transform_indices = @transform_7, window_bounds = array<i64: 64, 512>}, {pipeline_mode = #tpu.pipeline_mode<synchronous>, transform_indices = @transform_8, window_bounds = array<i64: 256, 64>}, {transform_indices = @transform_9, window_bounds = array<i64: 1, 4, 128>}]} {
    %c0 = arith.constant 0 : index
    %c0_0 = arith.constant 0 : index
    %c0_1 = arith.constant 0 : index
    %0 = vector.load %arg1[%c0, %c0_0, %c0_1] : memref<1x8x64xf32, #tpu.memory_space<vmem>>, vector<1x8x64xf32>
    %1 = vector.shape_cast %0 : vector<1x8x64xf32> to vector<8x64xf32>
    %2 = arith.mulf %1, %1 : vector<8x64xf32>
    %cst = arith.constant dense<0.000000e+00> : vector<8xf32>
    %3 = vector.multi_reduction <add>, %2, %cst [1] : vector<8x64xf32> to vector<8xf32>
    %4 = vector.shape_cast %3 : vector<8xf32> to vector<8x1xf32>
    %cst_2 = arith.constant 6.400000e+01 : f32
    %5 = vector.broadcast %cst_2 : f32 to vector<8x1xf32>
    %6 = arith.divf %4, %5 : vector<8x1xf32>
    %cst_3 = arith.constant 9.99999974E-6 : f32
    %7 = vector.broadcast %cst_3 : f32 to vector<8x1xf32>
    %8 = arith.addf %6, %7 : vector<8x1xf32>
    %9 = math.rsqrt %8 : vector<8x1xf32>
    %c0_4 = arith.constant 0 : index
    %c0_5 = arith.constant 0 : index
    %10 = vector.load %arg4[%c0_4, %c0_5] : memref<1x64xf32, #tpu.memory_space<vmem>>, vector<1x64xf32>
    %11 = vector.broadcast %9 : vector<8x1xf32> to vector<8x64xf32>
    %12 = arith.mulf %1, %11 : vector<8x64xf32>
    %13 = vector.broadcast %10 : vector<1x64xf32> to vector<8x64xf32>
    %14 = arith.mulf %13, %12 : vector<8x64xf32>
    %c0_6 = arith.constant 0 : index
    %c0_7 = arith.constant 0 : index
    %15 = vector.load %arg6[%c0_6, %c0_7] : memref<64x256xf32, #tpu.memory_space<vmem>>, vector<64x256xf32>
    %cst_8 = arith.constant dense<0.000000e+00> : vector<8x256xf32>
    %16 = tpu.matmul %14, %15, %cst_8 {dimension_numbers = #tpu.dot_dimension_numbers<[1], [0], [0], [1], [0, 0, 1, 1], [], []>} : vector<8x64xf32>, vector<64x256xf32>, vector<8x256xf32> -> vector<8x256xf32>
    %17 = vector.extract_strided_slice %16 {offsets = [0, 0], sizes = [8, 128], strides = [1, 1]} : vector<8x256xf32> to vector<8x128xf32>
    %c0_9 = arith.constant 0 : index
    %c0_10 = arith.constant 0 : index
    %18 = vector.load %arg2[%c0_9, %c0_10] : memref<8x128xf32, #tpu.memory_space<vmem>>, vector<8x128xf32>
    %19 = arith.mulf %17, %18 : vector<8x128xf32>
    %20 = vector.extract_strided_slice %16 {offsets = [0, 128], sizes = [8, 128], strides = [1, 1]} : vector<8x256xf32> to vector<8x128xf32>
    %c0_11 = arith.constant 0 : index
    %c0_12 = arith.constant 0 : index
    %21 = vector.load %arg3[%c0_11, %c0_12] : memref<8x128xf32, #tpu.memory_space<vmem>>, vector<8x128xf32>
    %22 = arith.mulf %20, %21 : vector<8x128xf32>
    %23 = arith.addf %19, %22 : vector<8x128xf32>
    %24 = tpu.transpose %23, [1, 0] : vector<8x128xf32> -> vector<128x8xf32>
    %25 = vector.extract_strided_slice %24 {offsets = [0, 0], sizes = [64, 8], strides = [1, 1]} : vector<128x8xf32> to vector<64x8xf32>
    %26 = vector.shape_cast %25 : vector<64x8xf32> to vector<4x16x8xf32>
    %27 = vector.extract_strided_slice %24 {offsets = [64, 0], sizes = [32, 8], strides = [1, 1]} : vector<128x8xf32> to vector<32x8xf32>
    %28 = vector.shape_cast %27 : vector<32x8xf32> to vector<2x16x8xf32>
    %29 = vector.extract_strided_slice %24 {offsets = [96, 0], sizes = [32, 8], strides = [1, 1]} : vector<128x8xf32> to vector<32x8xf32>
    %30 = vector.shape_cast %29 : vector<32x8xf32> to vector<2x16x8xf32>
    %31 = vector.shape_cast %28 : vector<2x16x8xf32> to vector<2x1x16x8xf32>
    %32 = vector.shape_cast %31 : vector<2x1x16x8xf32> to vector<2x1x16x8xf32>
    %33 = vector.broadcast %32 : vector<2x1x16x8xf32> to vector<2x2x16x8xf32>
    %34 = vector.shape_cast %33 : vector<2x2x16x8xf32> to vector<4x16x8xf32>
    %35 = vector.shape_cast %30 : vector<2x16x8xf32> to vector<2x1x16x8xf32>
    %36 = vector.shape_cast %35 : vector<2x1x16x8xf32> to vector<2x1x16x8xf32>
    %37 = vector.broadcast %36 : vector<2x1x16x8xf32> to vector<2x2x16x8xf32>
    %38 = vector.shape_cast %37 : vector<2x2x16x8xf32> to vector<4x16x8xf32>
    %39 = tpu.transpose %26, [0, 2, 1] : vector<4x16x8xf32> -> vector<4x8x16xf32>
    %40 = tpu.iota {dimensions = array<i32: 0>} : vector<8x8xi32>
    %41 = tpu.iota {dimensions = array<i32: 1>} : vector<8x8xi32>
    %42 = arith.cmpi sgt, %41, %40 : vector<8x8xi32>
    %cst_13 = arith.constant -1.000000e+30 : f32
    %cst_14 = arith.constant 0.000000e+00 : f32
    %43 = vector.broadcast %cst_13 : f32 to vector<8x8xf32>
    %44 = vector.broadcast %cst_14 : f32 to vector<8x8xf32>
    %45 = arith.select %42, %43, %44 : vector<8x8xi1>, vector<8x8xf32>
    "tpu.trace_start"() <{level = 10 : i32, message = "hqd,hdk->hqk"}> : () -> ()
    %cst_15 = arith.constant dense<0.000000e+00> : vector<4x8x8xf32>
    %46 = tpu.matmul %39, %34, %cst_15 {dimension_numbers = #tpu.dot_dimension_numbers<[2], [1], [1], [2], [0, 0, 0, 1, 1, 2], [0], [0]>} : vector<4x8x16xf32>, vector<4x16x8xf32>, vector<4x8x8xf32> -> vector<4x8x8xf32>
    "tpu.trace_stop"() : () -> ()
    %47 = vector.shape_cast %45 : vector<8x8xf32> to vector<1x8x8xf32>
    %48 = vector.broadcast %47 : vector<1x8x8xf32> to vector<4x8x8xf32>
    %49 = arith.addf %46, %48 : vector<4x8x8xf32>
    %cst_16 = arith.constant dense<0xFF800000> : vector<4x8xf32>
    %50 = vector.multi_reduction <maximumf>, %49, %cst_16 [2] : vector<4x8x8xf32> to vector<4x8xf32>
    %51 = vector.shape_cast %50 : vector<4x8xf32> to vector<4x8x1xf32>
    %52 = vector.broadcast %51 : vector<4x8x1xf32> to vector<4x8x8xf32>
    %53 = arith.subf %49, %52 : vector<4x8x8xf32>
    %54 = math.exp %53 : vector<4x8x8xf32>
    %cst_17 = arith.constant dense<0.000000e+00> : vector<4x8xf32>
    %55 = vector.multi_reduction <add>, %54, %cst_17 [2] : vector<4x8x8xf32> to vector<4x8xf32>
    %56 = vector.shape_cast %55 : vector<4x8xf32> to vector<4x8x1xf32>
    %57 = tpu.reciprocal %56 : vector<4x8x1xf32> -> vector<4x8x1xf32>
    %58 = vector.broadcast %57 : vector<4x8x1xf32> to vector<4x8x8xf32>
    %59 = arith.mulf %54, %58 : vector<4x8x8xf32>
    "tpu.trace_start"() <{level = 10 : i32, message = "hdk,hqk->hdq"}> : () -> ()
    %cst_18 = arith.constant dense<0.000000e+00> : vector<4x16x8xf32>
    %60 = tpu.matmul %38, %59, %cst_18 {dimension_numbers = #tpu.dot_dimension_numbers<[2], [2], [1], [1], [0, 0, 0, 1, 1, 1], [0], [0]>} : vector<4x16x8xf32>, vector<4x8x8xf32>, vector<4x16x8xf32> -> vector<4x16x8xf32>
    "tpu.trace_stop"() : () -> ()
    %61 = vector.shape_cast %60 : vector<4x16x8xf32> to vector<64x8xf32>
    %62 = tpu.transpose %61, [1, 0] : vector<64x8xf32> -> vector<8x64xf32>
    %c0_19 = arith.constant 0 : index
    %c0_20 = arith.constant 0 : index
    %63 = vector.load %arg7[%c0_19, %c0_20] : memref<64x64xf32, #tpu.memory_space<vmem>>, vector<64x64xf32>
    %cst_21 = arith.constant dense<0.000000e+00> : vector<8x64xf32>
    %64 = tpu.matmul %62, %63, %cst_21 {dimension_numbers = #tpu.dot_dimension_numbers<[1], [0], [0], [1], [0, 0, 1, 1], [], []>} : vector<8x64xf32>, vector<64x64xf32>, vector<8x64xf32> -> vector<8x64xf32>
    %65 = arith.addf %1, %64 : vector<8x64xf32>
    %66 = arith.mulf %65, %65 : vector<8x64xf32>
    %cst_22 = arith.constant dense<0.000000e+00> : vector<8xf32>
    %67 = vector.multi_reduction <add>, %66, %cst_22 [1] : vector<8x64xf32> to vector<8xf32>
    %68 = vector.shape_cast %67 : vector<8xf32> to vector<8x1xf32>
    %cst_23 = arith.constant 6.400000e+01 : f32
    %69 = vector.broadcast %cst_23 : f32 to vector<8x1xf32>
    %70 = arith.divf %68, %69 : vector<8x1xf32>
    %cst_24 = arith.constant 9.99999974E-6 : f32
    %71 = vector.broadcast %cst_24 : f32 to vector<8x1xf32>
    %72 = arith.addf %70, %71 : vector<8x1xf32>
    %73 = math.rsqrt %72 : vector<8x1xf32>
    %c0_25 = arith.constant 0 : index
    %c0_26 = arith.constant 0 : index
    %74 = vector.load %arg5[%c0_25, %c0_26] : memref<1x64xf32, #tpu.memory_space<vmem>>, vector<1x64xf32>
    %75 = vector.broadcast %73 : vector<8x1xf32> to vector<8x64xf32>
    %76 = arith.mulf %65, %75 : vector<8x64xf32>
    %77 = vector.broadcast %74 : vector<1x64xf32> to vector<8x64xf32>
    %78 = arith.mulf %77, %76 : vector<8x64xf32>
    %c0_27 = arith.constant 0 : index
    %c0_28 = arith.constant 0 : index
    %79 = vector.load %arg8[%c0_27, %c0_28] : memref<64x512xf32, #tpu.memory_space<vmem>>, vector<64x512xf32>
    %cst_29 = arith.constant dense<0.000000e+00> : vector<8x512xf32>
    %80 = tpu.matmul %78, %79, %cst_29 {dimension_numbers = #tpu.dot_dimension_numbers<[1], [0], [0], [1], [0, 0, 1, 1], [], []>} : vector<8x64xf32>, vector<64x512xf32>, vector<8x512xf32> -> vector<8x512xf32>
    %81 = vector.extract_strided_slice %80 {offsets = [0, 0], sizes = [8, 256], strides = [1, 1]} : vector<8x512xf32> to vector<8x256xf32>
    %82 = vector.extract_strided_slice %80 {offsets = [0, 256], sizes = [8, 256], strides = [1, 1]} : vector<8x512xf32> to vector<8x256xf32>
    %83 = arith.negf %81 : vector<8x256xf32>
    %84 = math.exp %83 : vector<8x256xf32>
    %cst_30 = arith.constant 1.000000e+00 : f32
    %85 = vector.broadcast %cst_30 : f32 to vector<8x256xf32>
    %86 = arith.addf %85, %84 : vector<8x256xf32>
    %87 = arith.divf %85, %86 : vector<8x256xf32>
    %88 = arith.mulf %81, %87 : vector<8x256xf32>
    %89 = arith.mulf %88, %82 : vector<8x256xf32>
    %c0_31 = arith.constant 0 : index
    %c0_32 = arith.constant 0 : index
    %90 = vector.load %arg9[%c0_31, %c0_32] : memref<256x64xf32, #tpu.memory_space<vmem>>, vector<256x64xf32>
    %cst_33 = arith.constant dense<0.000000e+00> : vector<8x64xf32>
    %91 = tpu.matmul %89, %90, %cst_33 {dimension_numbers = #tpu.dot_dimension_numbers<[1], [0], [0], [1], [0, 0, 1, 1], [], []>} : vector<8x256xf32>, vector<256x64xf32>, vector<8x64xf32> -> vector<8x64xf32>
    %92 = arith.addf %65, %91 : vector<8x64xf32>
    %93 = vector.extract_strided_slice %92 {offsets = [0, 0], sizes = [4, 64], strides = [1, 1]} : vector<8x64xf32> to vector<4x64xf32>
    %94 = vector.extract_strided_slice %92 {offsets = [4, 0], sizes = [4, 64], strides = [1, 1]} : vector<8x64xf32> to vector<4x64xf32>
    %95 = tpu.concatenate %93, %94 in 1 : vector<4x64xf32>, vector<4x64xf32> -> vector<4x128xf32>
    %c0_34 = arith.constant 0 : index
    %c0_35 = arith.constant 0 : index
    %c0_36 = arith.constant 0 : index
    %96 = vector.load %arg10[%c0_34, %c0_35, %c0_36] : memref<1x4x128xf32, #tpu.memory_space<vmem>>, vector<1x4x128xf32>
    %97 = vector.shape_cast %96 : vector<1x4x128xf32> to vector<4x128xf32>
    %98 = vector.shape_cast %95 : vector<4x128xf32> to vector<1x4x128xf32>
    tpu.vector_store %arg10[%c0_34, %c0_35, %c0_36], %98 {strides = array<i32>} : memref<1x4x128xf32, #tpu.memory_space<vmem>>, vector<1x4x128xf32>,
    return
  }
  func.func @transform_0(%arg0: i32) -> (i32, i32, i32) {
    %c0_i32 = arith.constant 0 : i32
    %c0_i32_0 = arith.constant 0 : i32
    %c0_i32_1 = arith.constant 0 : i32
    return %arg0, %c0_i32, %c0_i32_0 : i32, i32, i32
  }
  func.func @transform_1(%arg0: i32) -> (i32, i32) {
    %c0_i32 = arith.constant 0 : i32
    %c0_i32_0 = arith.constant 0 : i32
    %c0_i32_1 = arith.constant 0 : i32
    return %c0_i32, %c0_i32_0 : i32, i32
  }
  func.func @transform_2(%arg0: i32) -> (i32, i32) {
    %c0_i32 = arith.constant 0 : i32
    %c0_i32_0 = arith.constant 0 : i32
    %c0_i32_1 = arith.constant 0 : i32
    return %c0_i32, %c0_i32_0 : i32, i32
  }
  func.func @transform_3(%arg0: i32) -> (i32, i32) {
    %c0_i32 = arith.constant 0 : i32
    %c0_i32_0 = arith.constant 0 : i32
    %c0_i32_1 = arith.constant 0 : i32
    return %c0_i32, %c0_i32_0 : i32, i32
  }
  func.func @transform_4(%arg0: i32) -> (i32, i32) {
    %c0_i32 = arith.constant 0 : i32
    %c0_i32_0 = arith.constant 0 : i32
    %c0_i32_1 = arith.constant 0 : i32
    return %c0_i32, %c0_i32_0 : i32, i32
  }
  func.func @transform_5(%arg0: i32) -> (i32, i32) {
    %c0_i32 = arith.constant 0 : i32
    %c0_i32_0 = arith.constant 0 : i32
    %c0_i32_1 = arith.constant 0 : i32
    return %c0_i32, %c0_i32_0 : i32, i32
  }
  func.func @transform_6(%arg0: i32) -> (i32, i32) {
    %c0_i32 = arith.constant 0 : i32
    %c0_i32_0 = arith.constant 0 : i32
    %c0_i32_1 = arith.constant 0 : i32
    return %c0_i32, %c0_i32_0 : i32, i32
  }
  func.func @transform_7(%arg0: i32) -> (i32, i32) {
    %c0_i32 = arith.constant 0 : i32
    %c0_i32_0 = arith.constant 0 : i32
    %c0_i32_1 = arith.constant 0 : i32
    return %c0_i32, %c0_i32_0 : i32, i32
  }
  func.func @transform_8(%arg0: i32) -> (i32, i32) {
    %c0_i32 = arith.constant 0 : i32
    %c0_i32_0 = arith.constant 0 : i32
    %c0_i32_1 = arith.constant 0 : i32
    return %c0_i32, %c0_i32_0 : i32, i32
  }
  func.func @transform_9(%arg0: i32) -> (i32, i32, i32) {
    %c0_i32 = arith.constant 0 : i32
    %c0_i32_0 = arith.constant 0 : i32
    %c0_i32_1 = arith.constant 0 : i32
    return %arg0, %c0_i32, %c0_i32_0 : i32, i32, i32
  }
}

</mosaic_0001>

<bundles_post_ra>
// kernel: tpu_custom_call.1
= control target key start
LH: loop header
LB: loop body
LE: loop exit
PB: predicated region body
PF: predicated region fallthrough
CT: control target
= control target key end

     0   :  { %14 = vsyncpa [#allocation3], 0  ;;  %s2870_s0 = inlined_call_operand.vmem [shape: f32[2,8,64], index: 0, kind: input, shape index: {}]   ;;  %s2871_s1 = inlined_call_operand.vmem [shape: f32[8,128], index: 1, kind: input, shape index: {}]   ;;  %s2872_s2 = inlined_call_operand.hbm [shape: f32[8,128], index: 2, kind: input, shape index: {}]   ;;  %s2873_s3 = inlined_call_operand.vmem [shape: f32[1,64], index: 3, kind: input, shape index: {}]   ;;  %s2874_s4 = inlined_call_operand.vmem [shape: f32[1,64], index: 4, kind: input, shape index: {}]   ;;  %s2875_s5 = inlined_call_operand.vmem [shape: f32[64,256], index: 5, kind: input, shape index: {}]   ;;  %s2876_s6 = inlined_call_operand.hbm [shape: f32[64,64], index: 6, kind: input, shape index: {}]   ;;  %s2877_s7 = inlined_call_operand.vmem [shape: f32[64,512], index: 7, kind: input, shape index: {}]   ;;  %s2878_s8 = inlined_call_operand.vmem [shape: f32[256,64], index: 8, kind: input, shape index: {}]   ;;  %s2879_s9 = inlined_call_operand.hbm [shape: f32[2,4,128], index: 9, kind: output, shape index: {}]  }
   0x1   :  { %15 = vsyncpa [#allocation6], 0 }
   0x2   :  { %16 = vsyncpa [#allocation4], 0 }
   0x3   :  { %18 = vsyncpa [#allocation4 + $0x1], 0  ;;  %s2384_s30 = smov 0   ;;  %s2386_s10 = smov 0  }
   0x4   :  { %s2388_s11 = smov 0   ;;  %s2390_s12 = smov 0  }
   0x5 LB: > { %s2405_s13 = sadd.s32 4294967295, %s2323_s12   ;;  %s1826_s14 = sadd.s32 4294967294, %s2323_s12   ;;  %s2323_s12 = sphi %s2390_s12, %s2899_s12   ;;  %s2319_s11 = sphi %s2388_s11, %s2898_s11   ;;  %s2315_s10 = sphi %s2386_s10, %s2897_s10   ;;  %s2311_s30 = sphi %s2384_s30, %s2896_s30  }
   0x6   : > { %s2409_s15 = sadd.s32 1, %s2323_s12   ;;  %s225_s16 = sadd.s32 1, %s2319_s11 }
   0x7   : > { %s222_s17 = ssub.s32 %s2323_s12, %s2409_s15  ;;  %p235_p0 = scmp.ne.s32.totalorder %s2319_s11, %s2315_s10 }
   0x8   : > { %p223_p1 = scmp.eq.s32.totalorder %s222_s17, 0  ;;  %p236_p2 = scmp.eq.s32.totalorder %s2405_s13, 1 }
   0x9   : > { %p241_p3 = scmp.ne.s32.totalorder %s2315_s10, %s2311_s30  ;;  %p242_p4 = scmp.eq.s32.totalorder %s1826_s14, 1 }
   0xa   : > { %s2420_s18 = scalar_select %p223_p1, %s2319_s11, %s225_s16  }
   0xb   : > { %p2422_p5 = por %p236_p2, %p235_p0  ;;  %p2426_p6 = por %p242_p4, %p241_p3 }
   0xc   : > { %2883 = sst [smem:[#allocation11_spill]] %s2420_s18  ;;  %p1827_p7 = scmp.ge.s32.totalorder %s2323_s12, 1 }
   0xd   : > { %s2884_s19 = scalar_select %p2422_p5, 1, 0 }
   0xe   : > { %s2885_s20 = scalar_select %p2426_p6, 1, 0 }
   0xf   : > { %p249_p8 = scmp.lt.s32.totalorder %s2323_s12, 3  ;;  %p2880_p9 = scmp.eq.s32.totalorder %s2405_s13, 0 }
  0x10   : > { %s2325_s22 = smov [#allocation2]   ;;  %s2326_s24 = smov [#allocation5]  }
  0x11   : > { %p2433_p10 = pnand %p1827_p7, %p249_p8  ;;  %s265_s23 = sshll.u32 %s2325_s22, 4  ;;  %s266_s23 = int_to_ptr.vmem [resolvable:$true] %s265_s23 }
  0x12   : > { %s284_s25 = sshll.u32 %s2326_s24, 4  ;;  %s2197_s29 = scalar_lea.hbm %s2872_s2, 128  ;;  %s2445_s25 = int_to_ptr.vmem [resolvable:$true] %s284_s25 }
  0x13   : > { %s2886_s21 = scalar_select %p2433_p10, 1, 0 }
  0x14   : > { %p2113_p11 = pneg %p2433_p10  ;;  %p2198_p13 = scmp.ne.s32.totalorder %s2872_s2, %s2197_s29 }
  0x15   : > { %p2204_p3 = scmp.lt.u32.totalorder %s2197_s29, %s2872_s2 }
  0x16   : > { %p2441_p12 = pnand %p2880_p9, %p2113_p11 }
  0x18   : > { %p2199_p0 = pneg %p2441_p12 }
  0x1a   : > { %p2200_p1 = pnand %p2199_p0, %p2198_p13 }
  0x1c   : > { %p2201_p2 = pneg %p2200_p1 }
  0x1e   : > { %p2206_p4 = pnand %p2204_p3, %p2201_p2 }
  0x20   : > { %2209 = shalt.err (!%p2206_p4)
}
  0x21   : > { %s2210_s24 = scalar_lea.vmem %s266_s23, 128  ;;  %p2218_p9 = scmp.lt.s32.totalorder %s266_s23, %s266_s23 }
  0x22   : > { %p2211_p7 = scmp.ne.s32.totalorder %s266_s23, %s2210_s24  ;;  %p2219_p6 = scmp.lt.s32.totalorder %s2210_s24, %s2210_s24 }
  0x24   : > { %p2213_p8 = pnand %p2211_p7, %p2199_p0  ;;  %p2220_p5 = por %p2219_p6, %p2218_p9 }
  0x26   : > { %p2214_p11 = pneg %p2213_p8 }
  0x28   : > { %p2221_p10 = pnand %p2220_p5, %p2214_p11 }
  0x2a   : > { %2224 = shalt.err (!%p2221_p10)
}
  0x2b   : > { %2116 = dma.hbm_to_vmem [thread:$0]  (!%p2441_p12), %s2872_s2, 128, %s266_s23, [#allocation3]  }
  0x2c   : > { %s2225_s16 = scalar_lea.hbm %s2876_s6, 1024 }
  0x2d   : > { %p2226_p13 = scmp.ne.s32.totalorder %s2876_s6, %s2225_s16  ;;  %p2232_p9 = scmp.lt.u32.totalorder %s2225_s16, %s2876_s6 }
  0x2f   : > { %p2228_p6 = pnand %p2226_p13, %p2199_p0 }
  0x31   : > { %p2229_p5 = pneg %p2228_p6 }
  0x33   : > { %p2234_p10 = pnand %p2232_p9, %p2229_p5 }
  0x35   : > { %2237 = shalt.err (!%p2234_p10)
}
  0x36   : > { %s2238_s23 = scalar_lea.vmem %s2445_s25, 1024  ;;  %p2246_p4 = scmp.lt.s32.totalorder %s2445_s25, %s2445_s25 }
  0x37   : > { %p2239_p1 = scmp.ne.s32.totalorder %s2445_s25, %s2238_s23  ;;  %p2247_p7 = scmp.lt.s32.totalorder %s2238_s23, %s2238_s23 }
  0x39   : > { %p2241_p2 = pnand %p2239_p1, %p2199_p0  ;;  %p2248_p8 = por %p2247_p7, %p2246_p4 }
  0x3b   : > { %p2242_p3 = pneg %p2241_p2 }
  0x3d   : > { %p2249_p11 = pnand %p2248_p8, %p2242_p3 }
  0x3f   : > { %2252 = shalt.err (!%p2249_p11)
}
  0x40   : > { %s2327_s18 = smov 128   ;;  %s2328_s27 = smov 8  }
  0x41   : > { %2119 = dma.hbm_to_vmem [thread:$0]  (!%p2441_p12), %s2876_s6, 1024, %s2445_s25, [#allocation6], %s2327_s18, %s2327_s18, %s2328_s27  }
  0x42   : > { %p2888_p13 = scmp.ne.s32.totalorder %s2886_s21, 0 }
  0x43   : > { %p2889_p0 = scmp.eq.s32.totalorder (!%p2888_p13), %s2405_s13, 0 }
  0x44   : > { %313 = sbr.rel (%p2888_p13) target bundleno = 2570 (0xa0a), region = 56 }
  0x4b   : > { %2298 = dma.done.wait (%p2889_p0), [#allocation3], 128   ;;  %p2890_p6 = pmov %p2889_p0 }
  0x4c   : > { %p2891_p5 = pmov %p2889_p0 }
  0x4d   : > { %2300 = vsyncadd (%p2890_p6), [#allocation3], 4294967168 }
  0x4e   : > { %2302 = dma.done.wait (%p2891_p5), [#allocation6], 1024   ;;  %p2892_p9 = pmov %p2889_p0 }
  0x4f   : > { %p352_p10 = scmp.lt.s32.totalorder %s2405_s13, 1  ;;  %vm358_vm0 = vcmask 523264   ;;  %v376_v3 = vld [vmem:[%s2875_s5 + $0x8] sm:$0xff]  ;;  %v378_v4 = vld [vmem:[%s2875_s5 + $0x18] sm:$0xff]  ;;  %v375_v6 = vld [vmem:[%s2875_s5] sm:$0xff]  ;;  %v2329_v16 = vmov 0.0   ;;  %v630_v62 = vlaneseq }
  0x50   : > { %2304 = vsyncadd (%p2892_p9), [#allocation6], 4294966272  ;;  %v1999_v5 = vpack.c.bf16 %v378_v4, %v376_v3  ;;  %v377_v7 = vld [vmem:[%s2875_s5 + $0x10] sm:$0xff]  ;;  %v380_v9 = vld [vmem:[%s2875_s5 + $0x28] sm:$0xff]  ;;  %458 = vmatprep.mubr.f32.mxu0 %v2329_v16  ;;  %v2330_v42 = vmov 0.0|0.0   ;;  %vm2331_vm1 = vmmov 0  }
  0x51   : > { %s353_s26 = scalar_select %p352_p10, %s2405_s13, 1  ;;  %v2001_v8 = vpack.c.bf16 %v377_v7, %v375_v6  ;;  %v382_v10 = vld [vmem:[%s2875_s5 + $0x38] sm:$0xff]  ;;  %v379_v11 = vld [vmem:[%s2875_s5 + $0x20] sm:$0xff]  ;;  %v381_v13 = vld [vmem:[%s2875_s5 + $0x30] sm:$0xff]  ;;  %2021 = vmatprep.subr.bf16.mxu1 %v2330_v42  ;;  %1950 = vmatprep.mubr.msk.f32.mxu1 %vm2331_vm1, %v2329_v16  ;;  %vm636_vm2 = vcmask 130048   ;;  %vm929_vm3 = vcmask 64512  }
  0x52   : > { %2000 = vmatprep.subr.bf16.mxu0 %v1999_v5  ;;  %v2003_v12 = vpack.c.bf16 %v382_v10, %v380_v9  ;;  %v384_v14 = vld [vmem:[%s2875_s5 + $0x48] sm:$0xff]  ;;  %v386_v15 = vld [vmem:[%s2875_s5 + $0x58] sm:$0xff]  ;;  %v2005_v17 = vpack.c.bf16 %v381_v13, %v379_v11  ;;  %v383_v19 = vld [vmem:[%s2875_s5 + $0x40] sm:$0xff]  ;;  %v631_v63 = vshrl.u32 %v630_v62, 7  ;;  %s2332_s14 = smov 64   ;;  %s349_s21 = sand.u32 1, %s2315_s10  }
  0x53   : > { %s1835_s25 = sshll.u32 %s353_s26, 3  ;;  %2002 = vmatpush1.bf16.msra.mxu0 %v2001_v8  ;;  %v2007_v18 = vpack.c.bf16 %v386_v15, %v384_v14  ;;  %v385_v20 = vld [vmem:[%s2875_s5 + $0x50] sm:$0xff]  ;;  %v388_v21 = vld [vmem:[%s2875_s5 + $0x68] sm:$0xff]  ;;  %v390_v22 = vld [vmem:[%s2875_s5 + $0x78] sm:$0xff]  ;;  %s1861_s17 = sshll.u32 %s2405_s13, 6 }
  0x54   : > { %s355_s16 = scalar_lea.vmem %s2870_s0, %s1835_s25  ;;  %2004 = vmatprep.subr.bf16.mxu0 %v2003_v12  ;;  %v2009_v23 = vpack.c.bf16 %v385_v20, %v383_v19  ;;  %v2011_v24 = vpack.c.bf16 %v390_v22, %v388_v21  ;;  %v387_v25 = vld [vmem:[%s2875_s5 + $0x60] sm:$0xff]  ;;  %v389_v26 = vld [vmem:[%s2875_s5 + $0x70] sm:$0xff]  ;;  %s2827_s27 = scalar_lea.hbm %s2879_s9, %s1861_s17 }
  0x55   : > { %v2509_v0 = vld [vmem:[%s355_s16] sm:$0xff]  ;;  %v2013_v27 = vpack.c.bf16 %v389_v26, %v387_v25  ;;  %s1834_s16 = sshll.u32 %s349_s21, 2  ;;  %s1732_s28 = scalar_lea.sflag [#allocation4], %s349_s21 }
  0x56   : > { %v357_v1 = vmul.f32 %v2509_v0, %v2509_v0  ;;  %v1836_v32 = vld [vmem:[%s2873_s3] ss:$0 sm:$0xff]  ;;  %s351_s22 = scalar_lea.vmem [#allocation7], %s1834_s16  ;;  %p2893_p1 = scmp.ne.s32.totalorder %s2884_s19, 0 }
  0x57   : > { %2006 = vmatpush1.bf16.msra.mxu0 %v2005_v17  ;;  %v465_v35 = vld [vmem:[%s2871_s1] sm:$0xff]  ;;  %s1745_s24 = sshll.u32 %s351_s22, 4  ;;  %s2333_s13 = smov [#allocation7]   ;;  %s2829_s24 = int_to_ptr.vmem [resolvable:$true] %s1745_s24 }
  0x58   : > { %v359_v2 = vsel %vm358_vm0, %v357_v1, 0.0  ;;  %2008 = vmatprep.subr.bf16.mxu0 %v2007_v18  ;;  %v467_v36 = vld [vmem:[#allocation2] sm:$0xff]  ;;  %v633_v1 = vand.u32 127, %v630_v62  ;;  %v1334_v62 = vld [vmem:[#allocation5 + $0x20] sm:$0xff]  ;;  %s2253_s29 = scalar_lea.vmem %s2829_s24, 64  ;;  %s2257_s26 = sshll.u32 %s2333_s13, 4  ;;  %s2258_s26 = int_to_ptr.vmem [resolvable:$false] %s2257_s26 }
  0x59   : > { %360 = vadd.xlane.f32.xlu0 %v359_v2  ;;  %p2254_p12 = scmp.ne.s32.totalorder %s2829_s24, %s2253_s29  ;;  %s2259_s25 = scalar_lea.vmem %s2258_s26, 128 }
  0x5a   : > { %vm634_vm4 = vcmp.gt.s32.totalorder %v633_v1, %v631_v63  ;;  %v1335_v63 = vld [vmem:[#allocation5 + $0x28] sm:$0xff]  ;;  %p2260_p4 = scmp.lt.s32.totalorder %s2829_s24, %s2258_s26  ;;  %p2261_p7 = scmp.lt.s32.totalorder %s2259_s25, %s2253_s29 }
  0x5b   : > { %2010 = vmatpush1.bf16.msra.mxu0 %v2009_v23  ;;  %v635_v2 = vsel %vm634_vm4, -1e+30, %v2329_v16  ;;  %v2034_v1 = vpack.c.bf16 %v1335_v63, %v1334_v62  ;;  %v1454_v63 = vld [vmem:[%s2877_s7 + $0xd0] sm:$0xff]  ;;  %p2255_p2 = pnand %p2254_p12, %p2893_p1 }
  0x5c   : > { %2012 = vmatprep.subr.bf16.mxu0 %v2011_v24  ;;  %p2262_p8 = por %p2261_p7, %p2260_p4 }
  0x5d   : > { %p2256_p3 = pneg %p2255_p2 }
  0x5f   : > { %2014 = vmatpush1.bf16.msra.mxu0 %v2013_v27  ;;  %p2263_p11 = pnand %p2262_p8, %p2256_p3 }
  0x60   : > { %2015 = vmatprep.subr.bf16.mxu0 %v2330_v42 }
  0xe6   : > { %v361_v28 = vpop.xlane.xlu0 %360 }
  0xe7   : > { %v363_v29 = vmul.f32 0.015625, %v361_v28 }
  0xe9   : > { %v364_v30 = vadd.f32 1e-05, %v363_v29 }
  0xeb   : > { %2169 = vrsqrt.f32 %v364_v30 }
  0xf5   : > { %v2170_v31 = vpop.eup %2169 }
  0xf6   : > { %v367_v33 = vmul.f32 %v2170_v31, %v2509_v0 }
  0xf8   : > { %v374_v34 = vmul.f32 %v1836_v32, %v367_v33 }
  0xfa   : > { %1837 = vmatmul.mubr.msk.f32.vlgmr.msra.gmra.mrb[0].mxu0 %vm358_vm0, %v374_v34 }
  0xfb   : > { %1936 = vmatprep.mubr.msk.f32.mxu0 %vm2331_vm1, %v2329_v16 }
 0x1cd   : > { %v460_v37 = vpop.f32.mrb[0].mxu0 }
 0x1ce   : > { %v466_v38 = vmul.f32 %v465_v35, %v460_v37  ;;  %v462_v39 = vpop.f32.mrb[1].mxu0 }
 0x1cf   : > { %v468_v40 = vmul.f32 %v467_v36, %v462_v39 }
 0x1d1   : > { %v469_v41 = vadd.f32 %v468_v40, %v466_v38 }
 0x1d3   : > { %470 = vxpose.xlu0.b32.start.end [1/1] (short) %v469_v41, 128 }
 0x253   : > { %v486_v43 = vpop.trf.xlu0 }
 0x254   : > { %502 = vxpose.xlu1.b32.start [1/2] (short) (narrow) %v486_v43, 8 }
 0x257   : > { %v487_v44 = vpop.trf.xlu0 }
 0x258   : > { %503 = vxpose.xlu1.b32.end [2/2] (short) (narrow) %v487_v44, 8 }
 0x25b   : > { %v488_v45 = vpop.trf.xlu0 }
 0x25c   : > { %534 = vxpose.xlu1.b32.start [1/2] (short) (narrow) %v488_v45, 8 }
 0x25f   : > { %v489_v46 = vpop.trf.xlu0 }
 0x260   : > { %535 = vxpose.xlu1.b32.end [2/2] (short) (narrow) %v489_v46, 8 }
 0x263   : > { %v490_v47 = vpop.trf.xlu0 }
 0x264   : > { %566 = vxpose.xlu1.b32.start [1/2] (short) (narrow) %v490_v47, 8 }
 0x267   : > { %v491_v48 = vpop.trf.xlu0 }
 0x268   : > { %567 = vxpose.xlu1.b32.end [2/2] (short) (narrow) %v491_v48, 8 }
 0x26b   : > { %v492_v49 = vpop.trf.xlu0 }
 0x26c   : > { %598 = vxpose.xlu1.b32.start [1/2] (short) (narrow) %v492_v49, 8 }
 0x26f   : > { %v493_v50 = vpop.trf.xlu0 }
 0x270   : > { %599 = vxpose.xlu1.b32.end [2/2] (short) (narrow) %v493_v50, 8 }
 0x273   : > { %v494_v51 = vpop.trf.xlu0 }
 0x277   : > { %v495_v52 = vpop.trf.xlu0 }
 0x278   : > { %v2016_v53 = vpack.c.bf16 %v495_v52, %v494_v51 }
 0x27a   : > { %2017 = vmatpush3.bf16.msra.mxu0 %v2016_v53 }
 0x27b   : > { %2018 = vmatprep.subr.bf16.mxu0 %v2330_v42  ;;  %v496_v54 = vpop.trf.xlu0 }
 0x27f   : > { %v497_v55 = vpop.trf.xlu0 }
 0x280   : > { %v2022_v56 = vpack.c.bf16 %v497_v55, %v496_v54 }
 0x282   : > { %2023 = vmatpush3.bf16.msra.mxu1 %v2022_v56 }
 0x283   : > { %2024 = vmatprep.subr.bf16.mxu1 %v2330_v42  ;;  %v498_v61 = vpop.trf.xlu0 }
 0x287   : > { %v499_v20 = vpop.trf.xlu0 }
 0x28b   : > { %v500_v21 = vpop.trf.xlu0 }
 0x28f   : > { %v501_v24 = vpop.trf.xlu0 }
 0x2d4   : > { %v518_v57 = vpop.trf.xlu1 }
 0x2d5   : > { %1937 = vmatmul.mubr.msk.f32.vlgmr.msra.gmra.mrb[2].mxu0 %vm636_vm2, %v518_v57  ;;  %v1331_v57 = vld [vmem:[#allocation5 + $0x8] sm:$0xff] }
 0x2d6   : > { %2020 = vmatpush3.bf16.msra.mxu0 %v2016_v53  ;;  %1943 = vmatprep.mubr.msk.f32.mxu0 %vm2331_vm1, %v2329_v16 }
 0x2dc   : > { %v550_v58 = vpop.trf.xlu1 }
 0x2dd   : > { %1944 = vmatmul.mubr.msk.f32.vlgmr.msra.gmra.mrb[4].mxu0 %vm636_vm2, %v550_v58  ;;  %v1332_v58 = vld [vmem:[#allocation5 + $0x10] sm:$0xff] }
 0x2de   : > { %1962 = vmatprep.mubr.msk.f32.mxu0 %vm929_vm3, %v498_v61 }
 0x2e4   : > { %v582_v59 = vpop.trf.xlu1 }
 0x2e5   : > { %1951 = vmatmul.mubr.msk.f32.vlgmr.msra.gmra.mrb[0].mxu1 %vm636_vm2, %v582_v59 }
 0x2e6   : > { %2026 = vmatpush3.bf16.msra.mxu1 %v2022_v56  ;;  %1957 = vmatprep.mubr.msk.f32.mxu1 %vm2331_vm1, %v2329_v16  ;;  %v1330_v56 = vld [vmem:[#allocation5] sm:$0xff] }
 0x2e7   : > { %v2028_v59 = vpack.c.bf16 %v1331_v57, %v1330_v56  ;;  %v1455_v56 = vld [vmem:[%s2877_s7 + $0xd8] sm:$0xff] }
 0x2ec   : > { %v614_v60 = vpop.trf.xlu1 }
 0x2ed   : > { %1958 = vmatmul.mubr.msk.f32.vlgmr.msra.gmra.mrb[2].mxu1 %vm636_vm2, %v614_v60  ;;  %v1333_v60 = vld [vmem:[#allocation5 + $0x18] sm:$0xff] }
 0x2ee   : > { %1967 = vmatprep.mubr.msk.f32.mxu1 %vm929_vm3, %v498_v61  ;;  %v2031_v61 = vpack.c.bf16 %v1333_v60, %v1332_v58  ;;  %v1459_v58 = vld [vmem:[%s2877_s7 + $0xf8] sm:$0xff]  ;;  %v1456_v60 = vld [vmem:[%s2877_s7 + $0xe0] sm:$0xff] }
 0x3a8   : > { %v706_v3 = vpop.f32.mrb[2].mxu0 }
 0x3a9   : > { %v707_v4 = vadd.f32 %v706_v3, %v635_v2  ;;  %v1938_v5 = vpop.f32.mrb[3].mxu0  ;;  %v1337_v3 = vld [vmem:[#allocation5 + $0x38] sm:$0xff] }
 0x3ab   : > { %v930_v6 = vsel %vm929_vm3, %v707_v4, -inf }
 0x3ac   : > { %931 = vmax.xlane.f32.xlu1 %v930_v6 }
 0x3b0   : > { %v779_v7 = vpop.f32.mrb[4].mxu0 }
 0x3b1   : > { %v780_v8 = vadd.f32 %v779_v7, %v635_v2  ;;  %v1945_v9 = vpop.f32.mrb[5].mxu0 }
 0x3b3   : > { %v933_v10 = vsel %vm929_vm3, %v780_v8, -inf }
 0x3b4   : > { %934 = vmax.xlane.f32.xlu0 %v933_v10 }
 0x3b8   : > { %v852_v11 = vpop.f32.mrb[0].mxu1 }
 0x3b9   : > { %v853_v12 = vadd.f32 %v852_v11, %v635_v2  ;;  %v1952_v13 = vpop.f32.mrb[1].mxu1 }
 0x3bb   : > { %v936_v14 = vsel %vm929_vm3, %v853_v12, -inf }
 0x3bc   : > { %937 = vmax.xlane.f32.xlu1 %v936_v14 }
 0x3c0   : > { %v925_v15 = vpop.f32.mrb[2].mxu1 }
 0x3c1   : > { %v926_v17 = vadd.f32 %v925_v15, %v635_v2  ;;  %v1959_v18 = vpop.f32.mrb[3].mxu1  ;;  %v1336_v2 = vld [vmem:[#allocation5 + $0x30] sm:$0xff] }
 0x3c3   : > { %v939_v19 = vsel %vm929_vm3, %v926_v17, -inf }
 0x3c4   : > { %940 = vmax.xlane.f32.xlu1 %v939_v19  ;;  %v1429_v19 = vld [vmem:[%s2877_s7 + $0x8] sm:$0xff] }
 0x439   : > { %v932_v22 = vpop.xlane.xlu1 %931 }
 0x43a   : > { %v942_v23 = vsub.f32 %v707_v4, %v932_v22  ;;  %v2037_v4 = vpack.c.bf16 %v1337_v3, %v1336_v2  ;;  %v1428_v22 = vld [vmem:[%s2877_s7] sm:$0xff] }
 0x43c   : > { %v946_v25 = vmul.f32 1.442695, %v942_v23  ;;  %v1432_v23 = vld [vmem:[%s2877_s7 + $0x20] sm:$0xff] }
 0x43e   : > { %2171 = vpow2.f32 %v946_v25  ;;  %v2041_v25 = vpack.c.bf16 %v1432_v23, %v1428_v22  ;;  %v1642_v22 = vld [vmem:[%s2878_s8 + $0xa8] sm:$0xff] }
 0x441   : > { %v935_v26 = vpop.xlane.xlu0 %934 }
 0x442   : > { %v943_v27 = vsub.f32 %v780_v8, %v935_v26  ;;  %v1430_v26 = vld [vmem:[%s2877_s7 + $0x10] sm:$0xff] }
 0x444   : > { %v948_v28 = vmul.f32 1.442695, %v943_v27  ;;  %v1434_v27 = vld [vmem:[%s2877_s7 + $0x30] sm:$0xff] }
 0x446   : > { %2173 = vpow2.f32 %v948_v28  ;;  %v2057_v28 = vpack.c.bf16 %v1434_v27, %v1430_v26  ;;  %v1643_v27 = vld [vmem:[%s2878_s8 + $0xb0] sm:$0xff] }
 0x448   : > { %v2172_v29 = vpop.eup %2171 }
 0x449   : > { %v938_v30 = vpop.xlane.xlu1 %937  ;;  %v954_v31 = vsel %vm929_vm3, %v2172_v29, 0.0 }
 0x44a   : > { %v944_v32 = vsub.f32 %v853_v12, %v938_v30  ;;  %955 = vadd.xlane.f32.xlu1 %v954_v31  ;;  %v1441_v30 = vld [vmem:[%s2877_s7 + $0x68] sm:$0xff]  ;;  %v1439_v31 = vld [vmem:[%s2877_s7 + $0x58] sm:$0xff] }
 0x44c   : > { %v950_v33 = vmul.f32 1.442695, %v944_v32 }
 0x44e   : > { %2175 = vpow2.f32 %v950_v33  ;;  %v1443_v33 = vld [vmem:[%s2877_s7 + $0x78] sm:$0xff] }
 0x450   : > { %v2174_v34 = vpop.eup %2173 }
 0x451   : > { %v941_v35 = vpop.xlane.xlu1 %940  ;;  %v957_v36 = vsel %vm929_vm3, %v2174_v34, 0.0 }
 0x452   : > { %v945_v37 = vsub.f32 %v926_v17, %v941_v35  ;;  %958 = vadd.xlane.f32.xlu1 %v957_v36  ;;  %v1440_v35 = vld [vmem:[%s2877_s7 + $0x60] sm:$0xff]  ;;  %v2059_v36 = vpack.c.bf16 %v1443_v33, %v1439_v31  ;;  %v1628_v31 = vld [vmem:[%s2878_s8 + $0x38] sm:$0xff] }
 0x453   : > { %v1645_v33 = vld [vmem:[%s2878_s8 + $0xc0] sm:$0xff] }
 0x454   : > { %v952_v38 = vmul.f32 1.442695, %v945_v37 }
 0x456   : > { %2177 = vpow2.f32 %v952_v38  ;;  %v1438_v38 = vld [vmem:[%s2877_s7 + $0x50] sm:$0xff] }
 0x458   : > { %v2176_v39 = vpop.eup %2175 }
 0x459   : > { %v960_v40 = vsel %vm929_vm3, %v2176_v39, 0.0 }
 0x45a   : > { %961 = vadd.xlane.f32.xlu1 %v960_v40 }
 0x460   : > { %v2178_v41 = vpop.eup %2177 }
 0x461   : > { %v963_v43 = vsel %vm929_vm3, %v2178_v41, 0.0 }
 0x462   : > { %964 = vadd.xlane.f32.xlu1 %v963_v43  ;;  %v1449_v43 = vld [vmem:[%s2877_s7 + $0xa8] sm:$0xff] }
 0x4d7   : > { %v956_v44 = vpop.xlane.xlu1 %955 }
 0x4d8   : > { %2179 = vrcp.f32 %v956_v44  ;;  %v1447_v44 = vld [vmem:[%s2877_s7 + $0x98] sm:$0xff] }
 0x4df   : > { %v959_v45 = vpop.xlane.xlu1 %958 }
 0x4e0   : > { %2181 = vrcp.f32 %v959_v45 }
 0x4e2   : > { %v2180_v46 = vpop.eup %2179 }
 0x4e3   : > { %v970_v47 = vmul.f32 %v2180_v46, %v2172_v29  ;;  %v1437_v29 = vld [vmem:[%s2877_s7 + $0x48] sm:$0xff]  ;;  %v1451_v46 = vld [vmem:[%s2877_s7 + $0xb8] sm:$0xff] }
 0x4e4   : > { %v2043_v32 = vpack.c.bf16 %v1441_v30, %v1437_v29  ;;  %v1627_v30 = vld [vmem:[%s2878_s8 + $0x30] sm:$0xff] }
 0x4e5   : > { %1960 = vmatprep.subr.msk.mxu0 %vm929_vm3, %v970_v47 }
 0x4e6   : > { %1961 = vmatpush3.xpose.msk.msra.mxu0 %vm929_vm3, %v970_v47  ;;  %v1444_v47 = vld [vmem:[%s2877_s7 + $0x80] sm:$0xff] }
 0x4e7   : > { %v962_v48 = vpop.xlane.xlu1 %961 }
 0x4e8   : > { %2183 = vrcp.f32 %v962_v48  ;;  %v1448_v48 = vld [vmem:[%s2877_s7 + $0xa0] sm:$0xff] }
 0x4e9   : > { %1963 = vmatmul.mubr.msk.f32.vlgmr.msra.gmra.mrb[6].mxu0 %vm929_vm3, %v499_v20 }
 0x4ea   : > { %v2182_v49 = vpop.eup %2181  ;;  %1972 = vmatprep.mubr.msk.f32.mxu0 %vm929_vm3, %v500_v21 }
 0x4eb   : > { %v971_v50 = vmul.f32 %v2182_v49, %v2174_v34  ;;  %v1436_v34 = vld [vmem:[%s2877_s7 + $0x40] sm:$0xff]  ;;  %v2063_v49 = vpack.c.bf16 %v1451_v46, %v1447_v44  ;;  %v1632_v44 = vld [vmem:[%s2878_s8 + $0x58] sm:$0xff] }
 0x4ec   : > { %v2045_v37 = vpack.c.bf16 %v1440_v35, %v1436_v34  ;;  %v1646_v34 = vld [vmem:[%s2878_s8 + $0xc8] sm:$0xff]  ;;  %v1649_v46 = vld [vmem:[%s2878_s8 + $0xe0] sm:$0xff] }
 0x4ed   : > { %1965 = vmatprep.subr.msk.mxu1 %vm929_vm3, %v971_v50  ;;  %v2087_v35 = vpack.c.bf16 %v1646_v34, %v1645_v33 }
 0x4ee   : > { %1966 = vmatpush3.xpose.msk.msra.mxu1 %vm929_vm3, %v971_v50  ;;  %v2049_v50 = vpack.c.bf16 %v1448_v48, %v1444_v47  ;;  %v1650_v47 = vld [vmem:[%s2878_s8 + $0xe8] sm:$0xff] }
 0x4ef   : > { %v965_v51 = vpop.xlane.xlu1 %964  ;;  %v2095_v48 = vpack.c.bf16 %v1650_v47, %v1649_v46 }
 0x4f0   : > { %2185 = vrcp.f32 %v965_v51  ;;  %v1446_v51 = vld [vmem:[%s2877_s7 + $0x90] sm:$0xff] }
 0x4f1   : > { %1968 = vmatmul.mubr.msk.f32.vlgmr.msra.gmra.mrb[4].mxu1 %vm929_vm3, %v499_v20  ;;  %v1433_v20 = vld [vmem:[%s2877_s7 + $0x28] sm:$0xff] }
 0x4f2   : > { %v2184_v52 = vpop.eup %2183  ;;  %1977 = vmatprep.mubr.msk.f32.mxu1 %vm929_vm3, %v500_v21  ;;  %v1435_v21 = vld [vmem:[%s2877_s7 + $0x38] sm:$0xff] }
 0x4f3   : > { %v972_v53 = vmul.f32 %v2184_v52, %v2176_v39  ;;  %v1442_v39 = vld [vmem:[%s2877_s7 + $0x70] sm:$0xff] }
 0x4f4   : > { %v2061_v40 = vpack.c.bf16 %v1442_v39, %v1438_v38  ;;  %v1450_v52 = vld [vmem:[%s2877_s7 + $0xb0] sm:$0xff] }
 0x4f5   : > { %1970 = vmatprep.subr.msk.mxu0 %vm929_vm3, %v972_v53  ;;  %v1647_v39 = vld [vmem:[%s2878_s8 + $0xd0] sm:$0xff] }
 0x4f6   : > { %1971 = vmatpush3.xpose.msk.msra.mxu0 %vm929_vm3, %v972_v53  ;;  %v2065_v53 = vpack.c.bf16 %v1450_v52, %v1446_v51  ;;  %v1651_v52 = vld [vmem:[%s2878_s8 + $0xf0] sm:$0xff] }
 0x4f7   : > { %2027 = vmatprep.subr.bf16.mxu0 %v2330_v42 }
 0x4f9   : > { %1973 = vmatmul.mubr.msk.f32.vlgmr.msra.gmra.mrb[8].mxu0 %vm929_vm3, %v501_v24 }
 0x4fa   : > { %v2186_v54 = vpop.eup %2185  ;;  %1996 = vmatprep.mubr.msk.f32.mxu0 %vm2331_vm1, %v2329_v16  ;;  %2029 = vmatpush3.bf16.msra.mxu0 %v2028_v59  ;;  %v1452_v59 = vld [vmem:[%s2877_s7 + $0xc0] sm:$0xff] }
 0x4fb   : > { %v973_v55 = vmul.f32 %v2186_v54, %v2178_v41  ;;  %2030 = vmatprep.subr.bf16.mxu0 %v2330_v42  ;;  %v1445_v41 = vld [vmem:[%s2877_s7 + $0x88] sm:$0xff]  ;;  %v2053_v62 = vpack.c.bf16 %v1456_v60, %v1452_v59 }
 0x4fc   : > { %v2047_v45 = vpack.c.bf16 %v1449_v43, %v1445_v41  ;;  %v1453_v54 = vld [vmem:[%s2877_s7 + $0xc8] sm:$0xff]  ;;  %v1631_v43 = vld [vmem:[%s2878_s8 + $0x50] sm:$0xff] }
 0x4fd   : > { %1975 = vmatprep.subr.msk.mxu1 %vm929_vm3, %v973_v55 }
 0x4fe   : > { %1976 = vmatpush3.xpose.msk.msra.mxu1 %vm929_vm3, %v973_v55  ;;  %2032 = vmatpush3.bf16.msra.mxu0 %v2031_v61  ;;  %v1457_v55 = vld [vmem:[%s2877_s7 + $0xe8] sm:$0xff]  ;;  %v2067_v61 = vpack.c.bf16 %v1459_v58, %v1455_v56  ;;  %v1636_v56 = vld [vmem:[%s2878_s8 + $0x78] sm:$0xff] }
 0x4ff   : > { %2033 = vmatprep.subr.bf16.mxu0 %v2330_v42  ;;  %v2051_v57 = vpack.c.bf16 %v1457_v55, %v1453_v54  ;;  %v1635_v55 = vld [vmem:[%s2878_s8 + $0x70] sm:$0xff] }
 0x501   : > { %1978 = vmatmul.mubr.msk.f32.vlgmr.msra.gmra.mrb[6].mxu1 %vm929_vm3, %v501_v24 }
 0x502   : > { %1527 = vmatprep.mubr.f32.mxu1 %v2329_v16  ;;  %2035 = vmatpush3.bf16.msra.mxu0 %v2034_v1  ;;  %v1458_v1 = vld [vmem:[%s2877_s7 + $0xf0] sm:$0xff] }
 0x503   : > { %2036 = vmatprep.subr.bf16.mxu0 %v2330_v42  ;;  %v2069_v2 = vpack.c.bf16 %v1458_v1, %v1454_v63 }
 0x506   : > { %2038 = vmatpush3.bf16.msra.mxu0 %v2037_v4 }
 0x5bc   : > { %v1964_v5 = vpop.f32.mrb[6].mxu0 }
 0x5bd   : > { %v1049_v6 = vpop.f32.mrb[7].mxu0 }
 0x5be   : > { %1298 = vxpose.xlu1.b32.start [1/8] (short) (narrow) %v1049_v6, 8 }
 0x5c2   : > { %1299 = vxpose.xlu1.b32.cont [2/8] (short) (narrow) %v1964_v5, 8 }
 0x5c4   : > { %v1969_v7 = vpop.f32.mrb[4].mxu1 }
 0x5c5   : > { %v1127_v8 = vpop.f32.mrb[5].mxu1 }
 0x5c6   : > { %1300 = vxpose.xlu1.b32.cont [3/8] (short) (narrow) %v1127_v8, 8 }
 0x5ca   : > { %1301 = vxpose.xlu1.b32.cont [4/8] (short) (narrow) %v1969_v7, 8  ;;  %v1855_v7 = vld [vmem:[%s2874_s4] ss:$0 sm:$0xff] }
 0x5cc   : > { %v1974_v9 = vpop.f32.mrb[8].mxu0 }
 0x5cd   : > { %v1211_v10 = vpop.f32.mrb[9].mxu0 }
 0x5ce   : > { %1302 = vxpose.xlu1.b32.cont [5/8] (short) (narrow) %v1211_v10, 8  ;;  %v1637_v10 = vld [vmem:[%s2878_s8 + $0x80] sm:$0xff] }
 0x5d2   : > { %1303 = vxpose.xlu1.b32.cont [6/8] (short) (narrow) %v1974_v9, 8 }
 0x5d4   : > { %v1979_v11 = vpop.f32.mrb[6].mxu1 }
 0x5d5   : > { %v1289_v12 = vpop.f32.mrb[7].mxu1 }
 0x5d6   : > { %1304 = vxpose.xlu1.b32.cont [7/8] (short) (narrow) %v1289_v12, 8 }
 0x5da   : > { %1305 = vxpose.xlu1.b32.end [8/8] (short) (narrow) %v1979_v11, 8  ;;  %v1638_v11 = vld [vmem:[%s2878_s8 + $0x88] sm:$0xff] }
 0x5db   : > { %v2071_v12 = vpack.c.bf16 %v1638_v11, %v1637_v10 }
 0x63e   : > { %v1314_v13 = vpop.trf.xlu1 }
 0x63f   : > { %1997 = vmatmul.mubr.msk.f32.vlgmr.msra.gmra.mrb[10].mxu0 %vm358_vm0, %v1314_v13  ;;  %v1621_v13 = vld [vmem:[%s2878_s8] sm:$0xff] }
 0x640   : > { %1598 = vmatprep.mubr.f32.mxu0 %v2329_v16  ;;  %v2039_v16 = vpack.c.bf16 %v1433_v20, %v1429_v19  ;;  %v1623_v20 = vld [vmem:[%s2878_s8 + $0x10] sm:$0xff] }
 0x642   : > { %2040 = vmatprep.subr.bf16.mxu1 %v2039_v16 }
 0x643   : > { %2042 = vmatpush1.bf16.msra.mxu1 %v2041_v25  ;;  %v1626_v25 = vld [vmem:[%s2878_s8 + $0x28] sm:$0xff] }
 0x644   : > { %2044 = vmatprep.subr.bf16.mxu1 %v2043_v32  ;;  %v2085_v32 = vpack.c.bf16 %v1628_v31, %v1627_v30 }
 0x647   : > { %2046 = vmatpush1.bf16.msra.mxu1 %v2045_v37  ;;  %v1630_v37 = vld [vmem:[%s2878_s8 + $0x48] sm:$0xff] }
 0x648   : > { %2048 = vmatprep.subr.bf16.mxu1 %v2047_v45  ;;  %v2093_v45 = vpack.c.bf16 %v1632_v44, %v1631_v43 }
 0x64b   : > { %2050 = vmatpush1.bf16.msra.mxu1 %v2049_v50  ;;  %v1634_v50 = vld [vmem:[%s2878_s8 + $0x68] sm:$0xff] }
 0x64c   : > { %2052 = vmatprep.subr.bf16.mxu1 %v2051_v57  ;;  %v2101_v57 = vpack.c.bf16 %v1636_v56, %v1635_v55 }
 0x64f   : > { %2054 = vmatpush1.bf16.msra.mxu1 %v2053_v62 }
 0x650   : > { %2072 = vmatprep.subr.bf16.mxu1 %v2071_v12 }
 0x712   : > { %v1407_v42 = vpop.f32.mrb[10].mxu0 }
 0x713   : > { %v2618_v14 = vadd.f32 %v1407_v42, %v2509_v0  ;;  %v1998_v15 = vpop.f32.mrb[11].mxu0  ;;  %v1431_v0 = vld [vmem:[%s2877_s7 + $0x18] sm:$0xff]  ;;  %v1622_v42 = vld [vmem:[%s2878_s8 + $0x8] sm:$0xff] }
 0x714   : > { %v2055_v24 = vpack.c.bf16 %v1435_v21, %v1431_v0  ;;  %v2073_v15 = vpack.c.bf16 %v1622_v42, %v1621_v13  ;;  %v1624_v0 = vld [vmem:[%s2878_s8 + $0x18] sm:$0xff]  ;;  %v1641_v21 = vld [vmem:[%s2878_s8 + $0xa0] sm:$0xff] }
 0x715   : > { %v1412_v17 = vmul.f32 %v2618_v14, %v2618_v14  ;;  %v2077_v16 = vpack.c.bf16 %v1624_v0, %v1623_v20  ;;  %v2079_v23 = vpack.c.bf16 %v1642_v22, %v1641_v21 }
 0x716   : > { %2056 = vmatprep.subr.bf16.mxu0 %v2055_v24  ;;  %v1625_v24 = vld [vmem:[%s2878_s8 + $0x20] sm:$0xff] }
 0x717   : > { %v1413_v18 = vsel %vm358_vm0, %v1412_v17, 0.0  ;;  %2058 = vmatpush1.bf16.msra.mxu0 %v2057_v28  ;;  %v1639_v17 = vld [vmem:[%s2878_s8 + $0x90] sm:$0xff]  ;;  %v2081_v26 = vpack.c.bf16 %v1626_v25, %v1625_v24  ;;  %v1644_v28 = vld [vmem:[%s2878_s8 + $0xb8] sm:$0xff] }
 0x718   : > { %1414 = vadd.xlane.f32.xlu0 %v1413_v18  ;;  %2060 = vmatprep.subr.bf16.mxu0 %v2059_v36  ;;  %v1640_v18 = vld [vmem:[%s2878_s8 + $0x98] sm:$0xff]  ;;  %v2083_v29 = vpack.c.bf16 %v1644_v28, %v1643_v27  ;;  %v1629_v36 = vld [vmem:[%s2878_s8 + $0x40] sm:$0xff] }
 0x719   : > { %v2075_v19 = vpack.c.bf16 %v1640_v18, %v1639_v17  ;;  %v2089_v38 = vpack.c.bf16 %v1630_v37, %v1629_v36 }
 0x71b   : > { %2062 = vmatpush1.bf16.msra.mxu0 %v2061_v40  ;;  %v1648_v40 = vld [vmem:[%s2878_s8 + $0xd8] sm:$0xff] }
 0x71c   : > { %2064 = vmatprep.subr.bf16.mxu0 %v2063_v49  ;;  %v2091_v41 = vpack.c.bf16 %v1648_v40, %v1647_v39  ;;  %v1633_v49 = vld [vmem:[%s2878_s8 + $0x60] sm:$0xff] }
 0x71d   : > { %v2097_v51 = vpack.c.bf16 %v1634_v50, %v1633_v49 }
 0x71f   : > { %2066 = vmatpush1.bf16.msra.mxu0 %v2065_v53  ;;  %v1652_v53 = vld [vmem:[%s2878_s8 + $0xf8] sm:$0xff] }
 0x720   : > { %2068 = vmatprep.subr.bf16.mxu0 %v2067_v61  ;;  %v2099_v54 = vpack.c.bf16 %v1652_v53, %v1651_v52 }
 0x723   : > { %2070 = vmatpush1.bf16.msra.mxu0 %v2069_v2 }
 0x7a5   : > { %v1415_v3 = vpop.xlane.xlu0 %1414 }
 0x7a6   : > { %v1416_v4 = vmul.f32 0.015625, %v1415_v3 }
 0x7a8   : > { %v1417_v5 = vadd.f32 1e-05, %v1416_v4 }
 0x7aa   : > { %2187 = vrsqrt.f32 %v1417_v5 }
 0x7b4   : > { %v2188_v6 = vpop.eup %2187 }
 0x7b5   : > { %v1420_v8 = vmul.f32 %v2188_v6, %v2618_v14 }
 0x7b7   : > { %v1427_v9 = vmul.f32 %v1855_v7, %v1420_v8 }
 0x7b9   : > { %1856 = vmatmul.mubr.msk.f32.vlgmr.msra.gmra.mrb[8].mxu1 %vm358_vm0, %v1427_v9  ;;  %1857 = vmatmul.mubr.msk.f32.vlgmr.msra.gmra.mrb[12].mxu0 %vm358_vm0, %v1427_v9 }
 0x7ba   : > { %2074 = vmatpush3.bf16.msra.mxu1 %v2073_v15 }
 0x7bb   : > { %2076 = vmatprep.subr.bf16.mxu1 %v2075_v19 }
 0x7be   : > { %2078 = vmatpush3.bf16.msra.mxu1 %v2077_v16 }
 0x7bf   : > { %2080 = vmatprep.subr.bf16.mxu1 %v2079_v23 }
 0x7c2   : > { %2082 = vmatpush3.bf16.msra.mxu1 %v2081_v26 }
 0x7c3   : > { %2084 = vmatprep.subr.bf16.mxu1 %v2083_v29 }
 0x7c6   : > { %2086 = vmatpush3.bf16.msra.mxu1 %v2085_v32 }
 0x7c7   : > { %2088 = vmatprep.subr.bf16.mxu1 %v2087_v35 }
 0x7ca   : > { %2090 = vmatpush3.bf16.msra.mxu1 %v2089_v38 }
 0x7cb   : > { %2092 = vmatprep.subr.bf16.mxu1 %v2091_v41 }
 0x7ce   : > { %2094 = vmatpush3.bf16.msra.mxu1 %v2093_v45 }
 0x7cf   : > { %2096 = vmatprep.subr.bf16.mxu1 %v2095_v48 }
 0x7d2   : > { %2098 = vmatpush3.bf16.msra.mxu1 %v2097_v51 }
 0x7d3   : > { %2100 = vmatprep.subr.bf16.mxu1 %v2099_v54 }
 0x7d6   : > { %2102 = vmatpush3.bf16.msra.mxu1 %v2101_v57 }
 0x88c   : > { %v1529_v58 = vpop.f32.mrb[8].mxu1  ;;  %v1600_v59 = vpop.f32.mrb[12].mxu0 }
 0x88d   : > { %v1858_v60 = vmul.f32 -1.442695, %v1529_v58  ;;  %v1531_v61 = vpop.f32.mrb[9].mxu1  ;;  %v1602_v62 = vpop.f32.mrb[13].mxu0 }
 0x88e   : > { %v1859_v63 = vmul.f32 -1.442695, %v1531_v61 }
 0x88f   : > { %2189 = vpow2.f32 %v1858_v60 }
 0x890   : > { %2191 = vpow2.f32 %v1859_v63 }
 0x899   : > { %v2190_v1 = vpop.eup %2189 }
 0x89a   : > { %v2192_v2 = vpop.eup %2191  ;;  %v1611_v3 = vadd.f32 1.0, %v2190_v1 }
 0x89b   : > { %v1612_v4 = vadd.f32 1.0, %v2192_v2 }
 0x89c   : > { %2193 = vrcp.f32 %v1611_v3 }
 0x89d   : > { %2195 = vrcp.f32 %v1612_v4 }
 0x8a6   : > { %v2194_v5 = vpop.eup %2193 }
 0x8a7   : > { %v2196_v6 = vpop.eup %2195  ;;  %v1617_v7 = vmul.f32 %v2194_v5, %v1529_v58 }
 0x8a8   : > { %v1618_v8 = vmul.f32 %v2196_v6, %v1531_v61 }
 0x8a9   : > { %v1619_v9 = vmul.f32 %v1617_v7, %v1600_v59 }
 0x8aa   : > { %v1620_v10 = vmul.f32 %v1618_v8, %v1602_v62 }
 0x8ac   : > { %1717 = vmatprep.mubr.f32.mxu1 %v1620_v10 }
 0x8ad   : > { %1718 = vmatmul.mubr.f32.vlgmr.msra.gmra.mrb[10].mxu1 %v1619_v9 }
 0x980   : > { %v1929_v11 = vpop.f32.mrb[10].mxu1 }
 0x981   : > { %v1930_v12 = vpop.f32.mrb[11].mxu1 }
 0x982   : > { %v1931_v13 = vadd.f32 %v1930_v12, %v1929_v11 }
 0x984   : > { %v1723_v42 = vadd.f32 %v1931_v13, %v2618_v14 }
 0x986   : > { %v1725_v15 = vrot.slane %v1723_v42, 4 }
 0x988   : > { %1726 = vrot.lane.b32.xlu0 %v1725_v15, %s2332_s14 }
 0x9fa   : > { %v1727_v17 = vpop.permute.xlu0 %1726 }
 0x9fb   : > { %v1729_v14 = vsel %vm358_vm0, %v1723_v42, %v1727_v17 }
 0x9fc   : > { %1730 = vst [vmem:[%s351_s22] sm:$0xf] %v1729_v14 }
 0x9fd   : > { %2266 = shalt.err (!%p2263_p11)
}
 0x9fe   : > { %s2267_s14 = scalar_lea.hbm %s2827_s27, 64  ;;  %s2271_s17 = scalar_lea.hbm %s2879_s9, 128 }
 0x9ff   : > { %p2268_p13 = scmp.ne.s32.totalorder %s2827_s27, %s2267_s14  ;;  %p2272_p5 = scmp.lt.u32.totalorder %s2827_s27, %s2879_s9 }
 0xa00   : > { %p2273_p9 = scmp.lt.u32.totalorder %s2271_s17, %s2267_s14  ;;  %p2275_p12 = scmp.lt.u32.totalorder %s2267_s14, %s2827_s27 }
 0xa01   : > { %p2269_p0 = pnand %p2268_p13, %p2893_p1 }
 0xa02   : > { %p2274_p10 = por %p2273_p9, %p2272_p5 }
 0xa03   : > { %p2270_p6 = pneg %p2269_p0 }
 0xa04   : > { %p2276_p2 = por %p2275_p12, %p2274_p10 }
 0xa06   : > { %p2277_p3 = pnand %p2276_p2, %p2270_p6 }
 0xa08   : > { %2280 = shalt.err (!%p2277_p3)
}
 0xa09   : > { %2111 = dma.vmem_to_hbm [thread:$0]  (%p2893_p1), %s2829_s24, 64, %s2827_s27, %s1732_s28  }
 0xa0a PF: > { %p2128_p4 = scmp.ge.s32.totalorder %s2323_s12, 2  ;;  %s1757_s18 = sand.u32 1, %s2311_s30  }
 0xa0b   : > { %p2894_p7 = scmp.ne.s32.totalorder %s2885_s20, 0  ;;  %s1758_s29 = scalar_lea.sflag [#allocation4], %s1757_s18 }
 0xa0d   : > { %p2121_p8 = pnand %p2128_p4, %p2894_p7 }
 0xa0f   : > { %2306 = dma.done.wait (!%p2121_p8), %s1758_s29, 64  }
 0xa10   : > { %2308 = vsyncadd (!%p2121_p8), %s1758_s29, 4294967232  ;;  %s2895_s13 = sld [smem:[#allocation11_spill]]  ;;  %p21_p11 = scmp.ge.s32.totalorder %s2409_s15, 4  }
 0xa11   : > { %s2896_s30 = smov %s2315_s10  ;;  %s2897_s10 = smov %s2319_s11 }
 0xa12   : > { %s2899_s12 = smov %s2409_s15  ;;  %23 = sbr.rel (!%p21_p11) target bundleno = 5 (0x5), region = 100 }
 0xa16   : > { %s2898_s11 = smov %s2895_s13 }
 0xa19   :  { %1763 = vsyncpa [#allocation3], 1 }
 0xa1a   :  { %1765 = vsyncpa [#allocation3 + $0x1], 1 }
 0xa1b   :  { %1766 = vsyncpa [#allocation6], 1 }
 0xa1c   :  { %1767 = vsyncpa [#allocation4], 1 }
 0xa1d   :  { %1769 = vsyncpa [#allocation4 + $0x1], 1 }

</bundles_post_ra>
